<compile_context>
chip_gen: v7x
topology: tpu7x:2x2x1
jax: 0.10.0
libtpu: 0.0.40
codegen_flags: <defaults>
</compile_context>

<pallas_src>
import numpy as np
import jax
import jax.numpy as jnp
from jax.experimental import pallas as pl
from jax.experimental.pallas import tpu as pltpu  # noqa: F401  (TPU backend)

# ---- module hyper-parameters (small, consistent with the forward pass) ----
B = 2          # batch (number of sets)
N = 8          # set size (n)
D_IN = 4       # dim_in
D_V = 32       # dim_out (== dim_V)
N_HEADS = 4    # num_heads
D_SPLIT = D_V // N_HEADS
HN = N_HEADS * N          # per-batch flattened (head, key) axis = 32
BHN = B * HN              # global key axis = 64
BN = B * N                # global row axis = 16
LN_EPS = 1e-5             # torch.nn.LayerNorm default

# ---- packed-parameter slab layout (one DMA for all constants) -------------
SLAB_COLS = 64
R_WQ, R_WK, R_WV = 0, 8, 16      # (D_IN, D_V) each, aligned to sublane tiles
R_VEC = 24                       # 8 rows: bq, bk*s, bv, bo, g0, be0, g1, be1
R_WO = 32                        # (D_V, D_V)
R_REP = 64                       # (BHN, BN)   0/1 row-replication matrix
R_MBIG = 128                     # (BHN, D_V)  0/1 per-head feature mask
R_BLK = 192                      # (BHN, BHN)  0/1 same-head block-ones
R_QKM = 256                      # (BN,  BHN)  0/1 same-batch mask
SLAB_ROWS = 272


def _layernorm(h, gamma, beta):
    mean = jnp.mean(h, axis=-1, keepdims=True)
    var = jnp.mean(jnp.square(h - mean), axis=-1, keepdims=True)  # biased, like torch
    return (h - mean) * jax.lax.rsqrt(var + LN_EPS) * gamma + beta


def sab_kernel(x_ref, p_ref, out_ref):
    f32 = jnp.float32
    x = x_ref[...]                                             # (BN, D_IN)

    # ---- static views into the packed constant slab ----
    wq = p_ref[R_WQ:R_WQ + D_IN, 0:D_V]
    wk = p_ref[R_WK:R_WK + D_IN, 0:D_V]        # pre-scaled by 1/sqrt(D_V)
    wv = p_ref[R_WV:R_WV + D_IN, 0:D_V]
    vec = p_ref[R_VEC:R_VEC + 8, 0:D_V]        # (8, D_V) small vectors
    bq, bk, bv, bo = vec[0:1], vec[1:2], vec[2:3], vec[3:4]
    g0, be0, g1, be1 = vec[4:5], vec[5:6], vec[6:7], vec[7:8]
    wo = p_ref[R_WO:R_WO + D_V, 0:D_V]
    rep = p_ref[R_REP:R_REP + BHN, 0:BN]       # (64, 16)
    mbig = p_ref[R_MBIG:R_MBIG + BHN, 0:D_V]   # (64, 32)
    blk = p_ref[R_BLK:R_BLK + BHN, 0:BHN]      # (64, 64)
    qkm = p_ref[R_QKM:R_QKM + BN, 0:BHN]       # (16, 64)

    # ---- projections (no fused-lane slicing; each output is its own tile) ----
    q2 = jnp.dot(x, wq, preferred_element_type=f32) + bq              # (16, 32)
    x_rep = jnp.dot(rep, x, preferred_element_type=f32)               # (64, D_IN)
    k_big = (jnp.dot(x_rep, wk, preferred_element_type=f32) + bk) * mbig  # (64, 32)
    v_big = (jnp.dot(x_rep, wv, preferred_element_type=f32) + bv) * mbig  # (64, 32)

    # ---- all-(batch, head) attention as one 2-D matmul chain ----
    # s[row=(b,n), col=(b',h,m)] = q_h(b,n) . k_h(b',m) / sqrt(D_V)  (scale folded in K)
    s = jax.lax.dot_general(q2, k_big, (((1,), (1,)), ((), ())),
                            preferred_element_type=f32)               # (16, 64)
    s = s - jnp.max(s, axis=-1, keepdims=True)   # per-row constant; softmax-invariant
    p = jnp.exp(s) * qkm                          # zero cross-batch columns
    # per-(batch, head) softmax denominators via a same-head block-ones matmul;
    # cross-batch columns pick up the *same* positive denominator (no div-by-0).
    denom = jnp.dot(p, blk, preferred_element_type=f32)               # (16, 64)
    a = p * pl.reciprocal(denom, approx=False)    # approx=True breaks 1e-5 tol
    attn = jnp.dot(a, v_big, preferred_element_type=f32)              # (16, 32)

    # residual uses the (unscaled) Q projection, as in the reference
    h = q2 + attn

    # ---- layer_norm0 ; H + ReLU(fc_o(H)) ; layer_norm1 ----
    h = _layernorm(h, g0, be0)
    o = jnp.dot(h, wo, preferred_element_type=f32) + bo
    h = h + jnp.maximum(o, 0.0)                   # activation = ReLU
    h = _layernorm(h, g1, be1)

    out_ref[...] = h.astype(out_ref.dtype)


@jax.jit
def sab_forward(x, slab):
    x2 = x.reshape(BN, D_IN)                      # collapse batch into rows
    out2 = pl.pallas_call(
        sab_kernel,
        out_shape=jax.ShapeDtypeStruct((BN, D_V), jnp.float32),
    )(x2, slab)
    return out2.reshape(B, N, D_V)


def make_params(key):
    """Raw torch-style parameters (used by the plain-JAX reference)."""
    ks = jax.random.split(key, 8)
    sc_in = 1.0 / jnp.sqrt(D_IN)
    sc_v = 1.0 / jnp.sqrt(D_V)
    wq = jax.random.uniform(ks[0], (D_IN, D_V), jnp.float32, -sc_in, sc_in)
    bq = jax.random.uniform(ks[1], (1, D_V), jnp.float32, -sc_in, sc_in)
    wk = jax.random.uniform(ks[2], (D_IN, D_V), jnp.float32, -sc_in, sc_in)
    bk = jax.random.uniform(ks[3], (1, D_V), jnp.float32, -sc_in, sc_in)
    wv = jax.random.uniform(ks[4], (D_IN, D_V), jnp.float32, -sc_in, sc_in)
    bv = jax.random.uniform(ks[5], (1, D_V), jnp.float32, -sc_in, sc_in)
    wo = jax.random.uniform(ks[6], (D_V, D_V), jnp.float32, -sc_v, sc_v)
    bo = jax.random.uniform(ks[7], (1, D_V), jnp.float32, -sc_v, sc_v)
    g0 = jnp.ones((1, D_V), jnp.float32)
    be0 = jnp.zeros((1, D_V), jnp.float32)
    g1 = jnp.ones((1, D_V), jnp.float32)
    be1 = jnp.zeros((1, D_V), jnp.float32)
    return (wq, bq, wk, bk, wv, bv, wo, bo, g0, be0, g1, be1)


def pack_params(raw):
    """Fuse ALL kernel constants into one f32 slab (done once, not per call)."""
    wq, bq, wk, bk, wv, bv, wo, bo, g0, be0, g1, be1 = (np.asarray(a) for a in raw)
    scale = 1.0 / (D_V ** 0.5)            # fold score scale into K weights/bias
    slab = np.zeros((SLAB_ROWS, SLAB_COLS), np.float32)
    slab[R_WQ:R_WQ + D_IN, :D_V] = wq
    slab[R_WK:R_WK + D_IN, :D_V] = wk * scale
    slab[R_WV:R_WV + D_IN, :D_V] = wv
    slab[R_VEC + 0, :D_V] = bq[0]
    slab[R_VEC + 1, :D_V] = bk[0] * scale
    slab[R_VEC + 2, :D_V] = bv[0]
    slab[R_VEC + 3, :D_V] = bo[0]
    slab[R_VEC + 4, :D_V] = g0[0]
    slab[R_VEC + 5, :D_V] = be0[0]
    slab[R_VEC + 6, :D_V] = g1[0]
    slab[R_VEC + 7, :D_V] = be1[0]
    slab[R_WO:R_WO + D_V, :D_V] = wo

    # flattened key-axis index r = b*HN + h*N + m
    r = np.arange(BHN)
    b_of = r // HN
    h_of = (r // N) % N_HEADS
    m_of = r % N
    # REP: 0/1 row replication   k_big_rows <- k2 rows
    slab[R_REP + r, b_of * N + m_of] = 1.0
    # M_BIG: keep only head h's feature columns
    slab[R_MBIG:R_MBIG + BHN, :D_V] = (
        (np.arange(D_V)[None, :] // D_SPLIT) == h_of[:, None]).astype(np.float32)
    # BLK: same-head block-ones (batch-agnostic -> every column gets a positive denom)
    slab[R_BLK:R_BLK + BHN, :BHN] = (h_of[:, None] == h_of[None, :]).astype(np.float32)
    # QKMASK: query row (b*N+n) may only attend to keys of its own batch
    rows = np.arange(BN)
    slab[R_QKM:R_QKM + BN, :BHN] = ((rows[:, None] // N) == b_of[None, :]).astype(np.float32)
    return jnp.asarray(slab)


def sab_reference(x, raw):
    """Plain-JAX reference mirroring the PyTorch MAB forward, for verification."""
    wq, bq, wk, bk, wv, bv, wo, bo, g0, be0, g1, be1 = raw
    q = x @ wq + bq
    k = x @ wk + bk
    v = x @ wv + bv
    # split along feature into heads, concatenate along batch: [H*B, N, D_SPLIT]
    split = lambda t: jnp.concatenate(jnp.split(t, N_HEADS, axis=2), axis=0)
    q_, k_, v_ = split(q), split(k), split(v)
    a = jax.nn.softmax(jnp.einsum('bnd,bmd->bnm', q_, k_) / (D_V ** 0.5), axis=2)
    h = q_ + jnp.einsum('bnm,bmd->bnd', a, v_)
    h = jnp.concatenate(jnp.split(h, N_HEADS, axis=0), axis=2)       # [B, N, D_V]
    h = _layernorm(h, g0, be0)
    h = h + jnp.maximum(h @ wo + bo, 0.0)
    h = _layernorm(h, g1, be1)
    return h


if __name__ == "__main__":
    key = jax.random.PRNGKey(0)
    kx, kp = jax.random.split(key)
    x = jax.random.normal(kx, (B, N, D_IN), jnp.float32)
    raw = make_params(kp)
    slab = pack_params(raw)                      # packed once, reused every call

    out = jax.block_until_ready(sab_forward(x, slab))
    ref = jax.block_until_ready(sab_reference(x, raw))

    assert out.shape == (B, N, D_V)
    assert jnp.allclose(out, ref, atol=1e-5, rtol=1e-5), "mismatch vs reference"
    print("KERNEL_OK")
</pallas_src>

<mosaic_0001>
module attributes {stable_mosaic.version = 11 : i64} {
  func.func @sab_kernel(%arg0: memref<16x4xf32, #tpu.memory_space<vmem>>, %arg1: memref<272x64xf32, #tpu.memory_space<vmem>>, %arg2: memref<16x32xf32, #tpu.memory_space<vmem>>) attributes {dimension_semantics = [], scalar_prefetch = 0 : i64, scratch_operands = 0 : i64, tpu.core_type = #tpu.core_type<tc>} {
    %c0 = arith.constant 0 : index
    %c0_0 = arith.constant 0 : index
    %0 = vector.load %arg0[%c0, %c0_0] : memref<16x4xf32, #tpu.memory_space<vmem>>, vector<16x4xf32>
    %c0_1 = arith.constant 0 : index
    %c0_2 = arith.constant 0 : index
    %1 = vector.load %arg1[%c0_1, %c0_2] : memref<272x64xf32, #tpu.memory_space<vmem>>, vector<4x32xf32>
    %c8 = arith.constant 8 : index
    %c0_3 = arith.constant 0 : index
    %2 = vector.load %arg1[%c8, %c0_3] : memref<272x64xf32, #tpu.memory_space<vmem>>, vector<4x32xf32>
    %c16 = arith.constant 16 : index
    %c0_4 = arith.constant 0 : index
    %3 = vector.load %arg1[%c16, %c0_4] : memref<272x64xf32, #tpu.memory_space<vmem>>, vector<4x32xf32>
    %c24 = arith.constant 24 : index
    %c0_5 = arith.constant 0 : index
    %4 = vector.load %arg1[%c24, %c0_5] : memref<272x64xf32, #tpu.memory_space<vmem>>, vector<8x32xf32>
    %5 = vector.extract_strided_slice %4 {offsets = [0, 0], sizes = [1, 32], strides = [1, 1]} : vector<8x32xf32> to vector<1x32xf32>
    %6 = vector.extract_strided_slice %4 {offsets = [1, 0], sizes = [1, 32], strides = [1, 1]} : vector<8x32xf32> to vector<1x32xf32>
    %7 = vector.extract_strided_slice %4 {offsets = [2, 0], sizes = [1, 32], strides = [1, 1]} : vector<8x32xf32> to vector<1x32xf32>
    %8 = vector.extract_strided_slice %4 {offsets = [3, 0], sizes = [1, 32], strides = [1, 1]} : vector<8x32xf32> to vector<1x32xf32>
    %9 = vector.extract_strided_slice %4 {offsets = [4, 0], sizes = [1, 32], strides = [1, 1]} : vector<8x32xf32> to vector<1x32xf32>
    %10 = vector.extract_strided_slice %4 {offsets = [5, 0], sizes = [1, 32], strides = [1, 1]} : vector<8x32xf32> to vector<1x32xf32>
    %11 = vector.extract_strided_slice %4 {offsets = [6, 0], sizes = [1, 32], strides = [1, 1]} : vector<8x32xf32> to vector<1x32xf32>
    %12 = vector.extract_strided_slice %4 {offsets = [7, 0], sizes = [1, 32], strides = [1, 1]} : vector<8x32xf32> to vector<1x32xf32>
    %c32 = arith.constant 32 : index
    %c0_6 = arith.constant 0 : index
    %13 = vector.load %arg1[%c32, %c0_6] : memref<272x64xf32, #tpu.memory_space<vmem>>, vector<32x32xf32>
    %c64 = arith.constant 64 : index
    %c0_7 = arith.constant 0 : index
    %14 = vector.load %arg1[%c64, %c0_7] : memref<272x64xf32, #tpu.memory_space<vmem>>, vector<64x16xf32>
    %c128 = arith.constant 128 : index
    %c0_8 = arith.constant 0 : index
    %15 = vector.load %arg1[%c128, %c0_8] : memref<272x64xf32, #tpu.memory_space<vmem>>, vector<64x32xf32>
    %c192 = arith.constant 192 : index
    %c0_9 = arith.constant 0 : index
    %16 = vector.load %arg1[%c192, %c0_9] : memref<272x64xf32, #tpu.memory_space<vmem>>, vector<64x64xf32>
    %c256 = arith.constant 256 : index
    %c0_10 = arith.constant 0 : index
    %17 = vector.load %arg1[%c256, %c0_10] : memref<272x64xf32, #tpu.memory_space<vmem>>, vector<16x64xf32>
    %cst = arith.constant dense<0.000000e+00> : vector<16x32xf32>
    %18 = tpu.matmul %0, %1, %cst {dimension_numbers = #tpu.dot_dimension_numbers<[1], [0], [0], [1], [0, 0, 1, 1], [], []>} : vector<16x4xf32>, vector<4x32xf32>, vector<16x32xf32> -> vector<16x32xf32>
    %19 = vector.broadcast %5 : vector<1x32xf32> to vector<16x32xf32>
    %20 = arith.addf %18, %19 : vector<16x32xf32>
    %cst_11 = arith.constant dense<0.000000e+00> : vector<64x4xf32>
    %21 = tpu.matmul %14, %0, %cst_11 {dimension_numbers = #tpu.dot_dimension_numbers<[1], [0], [0], [1], [0, 0, 1, 1], [], []>} : vector<64x16xf32>, vector<16x4xf32>, vector<64x4xf32> -> vector<64x4xf32>
    %cst_12 = arith.constant dense<0.000000e+00> : vector<64x32xf32>
    %22 = tpu.matmul %21, %2, %cst_12 {dimension_numbers = #tpu.dot_dimension_numbers<[1], [0], [0], [1], [0, 0, 1, 1], [], []>} : vector<64x4xf32>, vector<4x32xf32>, vector<64x32xf32> -> vector<64x32xf32>
    %23 = vector.broadcast %6 : vector<1x32xf32> to vector<64x32xf32>
    %24 = arith.addf %22, %23 : vector<64x32xf32>
    %25 = arith.mulf %24, %15 : vector<64x32xf32>
    %cst_13 = arith.constant dense<0.000000e+00> : vector<64x32xf32>
    %26 = tpu.matmul %21, %3, %cst_13 {dimension_numbers = #tpu.dot_dimension_numbers<[1], [0], [0], [1], [0, 0, 1, 1], [], []>} : vector<64x4xf32>, vector<4x32xf32>, vector<64x32xf32> -> vector<64x32xf32>
    %27 = vector.broadcast %7 : vector<1x32xf32> to vector<64x32xf32>
    %28 = arith.addf %26, %27 : vector<64x32xf32>
    %29 = arith.mulf %28, %15 : vector<64x32xf32>
    %cst_14 = arith.constant dense<0.000000e+00> : vector<16x64xf32>
    %30 = tpu.matmul %20, %25, %cst_14 {dimension_numbers = #tpu.dot_dimension_numbers<[1], [1], [0], [0], [0, 0, 1, 0], [], []>} : vector<16x32xf32>, vector<64x32xf32>, vector<16x64xf32> -> vector<16x64xf32>
    %cst_15 = arith.constant dense<0xFF800000> : vector<16xf32>
    %31 = vector.multi_reduction <maximumf>, %30, %cst_15 [1] : vector<16x64xf32> to vector<16xf32>
    %32 = vector.shape_cast %31 : vector<16xf32> to vector<16x1xf32>
    %33 = vector.broadcast %32 : vector<16x1xf32> to vector<16x64xf32>
    %34 = arith.subf %30, %33 : vector<16x64xf32>
    %35 = math.exp %34 : vector<16x64xf32>
    %36 = arith.mulf %35, %17 : vector<16x64xf32>
    %cst_16 = arith.constant dense<0.000000e+00> : vector<16x64xf32>
    %37 = tpu.matmul %36, %16, %cst_16 {dimension_numbers = #tpu.dot_dimension_numbers<[1], [0], [0], [1], [0, 0, 1, 1], [], []>} : vector<16x64xf32>, vector<64x64xf32>, vector<16x64xf32> -> vector<16x64xf32>
    %38 = tpu.reciprocal %37 : vector<16x64xf32> -> vector<16x64xf32>
    %39 = arith.mulf %36, %38 : vector<16x64xf32>
    %cst_17 = arith.constant dense<0.000000e+00> : vector<16x32xf32>
    %40 = tpu.matmul %39, %29, %cst_17 {dimension_numbers = #tpu.dot_dimension_numbers<[1], [0], [0], [1], [0, 0, 1, 1], [], []>} : vector<16x64xf32>, vector<64x32xf32>, vector<16x32xf32> -> vector<16x32xf32>
    %41 = arith.addf %20, %40 : vector<16x32xf32>
    %cst_18 = arith.constant dense<0.000000e+00> : vector<16xf32>
    %42 = vector.multi_reduction <add>, %41, %cst_18 [1] : vector<16x32xf32> to vector<16xf32>
    %43 = vector.shape_cast %42 : vector<16xf32> to vector<16x1xf32>
    %cst_19 = arith.constant 3.200000e+01 : f32
    %44 = vector.broadcast %cst_19 : f32 to vector<16x1xf32>
    %45 = arith.divf %43, %44 : vector<16x1xf32>
    %46 = vector.broadcast %45 : vector<16x1xf32> to vector<16x32xf32>
    %47 = arith.subf %41, %46 : vector<16x32xf32>
    %48 = arith.mulf %47, %47 : vector<16x32xf32>
    %cst_20 = arith.constant dense<0.000000e+00> : vector<16xf32>
    %49 = vector.multi_reduction <add>, %48, %cst_20 [1] : vector<16x32xf32> to vector<16xf32>
    %50 = vector.shape_cast %49 : vector<16xf32> to vector<16x1xf32>
    %cst_21 = arith.constant 3.200000e+01 : f32
    %51 = vector.broadcast %cst_21 : f32 to vector<16x1xf32>
    %52 = arith.divf %50, %51 : vector<16x1xf32>
    %53 = vector.broadcast %45 : vector<16x1xf32> to vector<16x32xf32>
    %54 = arith.subf %41, %53 : vector<16x32xf32>
    %cst_22 = arith.constant 9.99999974E-6 : f32
    %55 = vector.broadcast %cst_22 : f32 to vector<16x1xf32>
    %56 = arith.addf %52, %55 : vector<16x1xf32>
    %57 = math.rsqrt %56 : vector<16x1xf32>
    %58 = vector.broadcast %57 : vector<16x1xf32> to vector<16x32xf32>
    %59 = arith.mulf %54, %58 : vector<16x32xf32>
    %60 = vector.broadcast %9 : vector<1x32xf32> to vector<16x32xf32>
    %61 = arith.mulf %59, %60 : vector<16x32xf32>
    %62 = vector.broadcast %10 : vector<1x32xf32> to vector<16x32xf32>
    %63 = arith.addf %61, %62 : vector<16x32xf32>
    %cst_23 = arith.constant dense<0.000000e+00> : vector<16x32xf32>
    %64 = tpu.matmul %63, %13, %cst_23 {dimension_numbers = #tpu.dot_dimension_numbers<[1], [0], [0], [1], [0, 0, 1, 1], [], []>} : vector<16x32xf32>, vector<32x32xf32>, vector<16x32xf32> -> vector<16x32xf32>
    %65 = vector.broadcast %8 : vector<1x32xf32> to vector<16x32xf32>
    %66 = arith.addf %64, %65 : vector<16x32xf32>
    %cst_24 = arith.constant 0.000000e+00 : f32
    %67 = vector.broadcast %cst_24 : f32 to vector<16x32xf32>
    %68 = arith.maximumf %66, %67 : vector<16x32xf32>
    %69 = arith.addf %63, %68 : vector<16x32xf32>
    %cst_25 = arith.constant dense<0.000000e+00> : vector<16xf32>
    %70 = vector.multi_reduction <add>, %69, %cst_25 [1] : vector<16x32xf32> to vector<16xf32>
    %71 = vector.shape_cast %70 : vector<16xf32> to vector<16x1xf32>
    %cst_26 = arith.constant 3.200000e+01 : f32
    %72 = vector.broadcast %cst_26 : f32 to vector<16x1xf32>
    %73 = arith.divf %71, %72 : vector<16x1xf32>
    %74 = vector.broadcast %73 : vector<16x1xf32> to vector<16x32xf32>
    %75 = arith.subf %69, %74 : vector<16x32xf32>
    %76 = arith.mulf %75, %75 : vector<16x32xf32>
    %cst_27 = arith.constant dense<0.000000e+00> : vector<16xf32>
    %77 = vector.multi_reduction <add>, %76, %cst_27 [1] : vector<16x32xf32> to vector<16xf32>
    %78 = vector.shape_cast %77 : vector<16xf32> to vector<16x1xf32>
    %cst_28 = arith.constant 3.200000e+01 : f32
    %79 = vector.broadcast %cst_28 : f32 to vector<16x1xf32>
    %80 = arith.divf %78, %79 : vector<16x1xf32>
    %81 = vector.broadcast %73 : vector<16x1xf32> to vector<16x32xf32>
    %82 = arith.subf %69, %81 : vector<16x32xf32>
    %cst_29 = arith.constant 9.99999974E-6 : f32
    %83 = vector.broadcast %cst_29 : f32 to vector<16x1xf32>
    %84 = arith.addf %80, %83 : vector<16x1xf32>
    %85 = math.rsqrt %84 : vector<16x1xf32>
    %86 = vector.broadcast %85 : vector<16x1xf32> to vector<16x32xf32>
    %87 = arith.mulf %82, %86 : vector<16x32xf32>
    %88 = vector.broadcast %11 : vector<1x32xf32> to vector<16x32xf32>
    %89 = arith.mulf %87, %88 : vector<16x32xf32>
    %90 = vector.broadcast %12 : vector<1x32xf32> to vector<16x32xf32>
    %91 = arith.addf %89, %90 : vector<16x32xf32>
    %c0_30 = arith.constant 0 : index
    %c0_31 = arith.constant 0 : index
    %92 = vector.load %arg2[%c0_30, %c0_31] : memref<16x32xf32, #tpu.memory_space<vmem>>, vector<16x32xf32>
    tpu.vector_store %arg2[%c0_30, %c0_31], %91 {strides = array<i32>} : memref<16x32xf32, #tpu.memory_space<vmem>>, vector<16x32xf32>,
    return
  }
}

</mosaic_0001>

<bundles_post_ra>
// kernel: sab_forward.1
= control target key start
LH: loop header
LB: loop body
LE: loop exit
PB: predicated region body
PF: predicated region fallthrough
CT: control target
= control target key end

     0   :  { %vm138_vm0 = vcmask 130048   ;;  %vm52_vm1 = vcmask 31744   ;;  %vm59_vm2 = vcmask 1043456   ;;  %s1589_s0 = inlined_call_operand.vmem [shape: f32[16,4], index: 0, kind: input, shape index: {}]   ;;  %s1590_s1 = inlined_call_operand.vmem [shape: f32[272,64], index: 1, kind: input, shape index: {}]   ;;  %s1591_s2 = inlined_call_operand.hbm [shape: f32[16,32], index: 2, kind: output, shape index: {}]  }
   0x1   :  { %v12_v0 = vld [vmem:[%s1589_s0] sm:$0xff]  ;;  %v13_v1 = vld [vmem:[%s1589_s0 + $0x8] sm:$0xff] }
   0x2   :  { %v22_v2 = vld [vmem:[%s1590_s1 + $0x40] sm:$0xff]  ;;  %v1234_v3 = vpack.c.bf16 %v13_v1, %v12_v0  ;;  %1119 = vmatprep.mubr.msk.f32.mxu0 %vm52_vm1, %v12_v0  ;;  %v15_v5 = vld [vmem:[%s1590_s1 + $0x8] sm:$0xf] }
   0x3   :  { %1126 = vmatprep.mubr.msk.f32.mxu1 %vm138_vm0, %v22_v2  ;;  %v14_v4 = vld [vmem:[%s1590_s1] sm:$0xf]  ;;  %v23_v6 = vld [vmem:[%s1590_s1 + $0x48] sm:$0xff] }
   0x4   :  { %1235 = vmatprep.subr.bf16.mxu1 %v1234_v3  ;;  %1117 = vmatprep.subr.msk.mxu0 %vm59_vm2, %v14_v4 }
   0x5   :  { %1237 = vmatpush3.bf16.msra.mxu1 %v1234_v3 }
   0x6   :  { %7 = vsyncpa [#allocation3], 0  ;;  %v24_v7 = vld [vmem:[%s1590_s1 + $0x50] sm:$0xff]  ;;  %1118 = vmatpush3.msk.msra.mxu0 %vm59_vm2, %v14_v4  ;;  %v25_v8 = vld [vmem:[%s1590_s1 + $0x58] sm:$0xff]  ;;  %v48_v17 = vlaneseq  ;;  %vm532_vm3 = vcmask 261120   ;;  %vm638_vm5 = vcmask 523264  }
   0x7   :  { %1120 = vmatmul.mubr.msk.f32.vlgmr.msra.gmra.mrb[0].mxu0 %vm52_vm1, %v13_v1  ;;  %1138 = vmatprep.subr.msk.mxu0 %vm59_vm2, %v15_v5  ;;  %v26_v9 = vld [vmem:[%s1590_s1 + $0x60] sm:$0xff]  ;;  %v27_v10 = vld [vmem:[%s1590_s1 + $0x68] sm:$0xff]  ;;  %v28_v11 = vld [vmem:[%s1590_s1 + $0x70] sm:$0xff] }
   0x8   :  { %1127 = vmatmul.mubr.msk.f32.vlgmr.msra.gmra.mrb[0].mxu1 %vm138_vm0, %v23_v6  ;;  %1139 = vmatpush3.msk.msra.mxu0 %vm59_vm2, %v15_v5  ;;  %v29_v12 = vld [vmem:[%s1590_s1 + $0x78] sm:$0xff]  ;;  %v16_v13 = vld [vmem:[%s1590_s1 + $0x10] sm:$0xf]  ;;  %v38_v14 = vld [vmem:[%s1590_s1 + $0xc0] sm:$0xff]  ;;  %v1424_v18 = vshrl.u32 %v48_v17, 7 }
   0x9   :  { %1129 = vmatprep.mubr.msk.f32.mxu1 %vm138_vm0, %v24_v7  ;;  %1152 = vmatprep.subr.msk.mxu1 %vm59_vm2, %v16_v13  ;;  %v39_v15 = vld [vmem:[%s1590_s1 + $0xc8] sm:$0xff]  ;;  %v1430_v20 = vld [vmem:[%s1590_s1 + $0x18] sm:$0xff]  ;;  %v40_v22 = vld [vmem:[%s1590_s1 + $0xd0] sm:$0xff] }
   0xa   :  { %1153 = vmatpush3.msk.msra.mxu1 %vm59_vm2, %v16_v13  ;;  %v1262_v16 = vpack.c.bf16 %v39_v15, %v38_v14  ;;  %v50_v19 = vsub.s32 0, %v1424_v18  ;;  %v41_v23 = vld [vmem:[%s1590_s1 + $0xd8] sm:$0xff]  ;;  %v42_v37 = vld [vmem:[%s1590_s1 + $0xe0] sm:$0xff]  ;;  %v43_v38 = vld [vmem:[%s1590_s1 + $0xe8] sm:$0xff]  ;;  %v270_v43 = vsub.s32 1, %v1424_v18  ;;  %v414_v44 = vsub.s32 2, %v1424_v18 }
   0xb   :  { %v1266_v29 = vpack.c.bf16 %v41_v23, %v40_v22  ;;  %v1270_v39 = vpack.c.bf16 %v43_v38, %v42_v37  ;;  %v44_v40 = vld [vmem:[%s1590_s1 + $0xf0] sm:$0xff]  ;;  %v45_v41 = vld [vmem:[%s1590_s1 + $0xf8] sm:$0xff]  ;;  %v31_v47 = vld [vmem:[%s1590_s1 + $0x88] sm:$0xff] }
   0xc   :  { %1130 = vmatmul.mubr.msk.f32.gmra.mrb[2].mxu1 %vm138_vm0, %v25_v8  ;;  %1263 = vmatprep.subr.bf16.mxu1 %v1262_v16  ;;  %v51_v21 = vrot.slane %v1430_v20, %v50_v19  ;;  %v1274_v42 = vpack.c.bf16 %v45_v41, %v44_v40  ;;  %v271_v45 = vrot.slane %v1430_v20, %v270_v43  ;;  %v30_v52 = vld [vmem:[%s1590_s1 + $0x80] sm:$0xff]  ;;  %v33_v61 = vld [vmem:[%s1590_s1 + $0x98] sm:$0xff]  ;;  %v32_v2 = vld [vmem:[%s1590_s1 + $0x90] sm:$0xff] }
   0xd   :  { %1132 = vmatprep.mubr.msk.f32.mxu1 %vm138_vm0, %v26_v9  ;;  %v415_v46 = vrot.slane %v1430_v20, %v414_v44  ;;  %vm1491_vm4 = vmpackc.low %vm532_vm3, %vm532_vm3  ;;  %v35_v14 = vld [vmem:[%s1590_s1 + $0xa8] sm:$0xff] }
  0x10   :  { %1133 = vmatmul.mubr.msk.f32.gmra.mrb[4].mxu1 %vm138_vm0, %v27_v10 }
  0x11   :  { %1135 = vmatprep.mubr.msk.f32.mxu1 %vm138_vm0, %v28_v11 }
  0x14   :  { %1136 = vmatmul.mubr.msk.f32.gmra.mrb[6].mxu1 %vm138_vm0, %v29_v12 }
  0xda   :  { %v1121_v24 = vpop.f32.mrb[0].mxu0 }
  0xdb   :  { %v1128_v25 = vpop.f32.mrb[0].mxu1  ;;  %v1439_v26 = vadd.f32 %v1121_v24, %v51_v21  ;;  %v129_v27 = vpop.f32.mrb[1].mxu0 }
  0xdc   :  { %v229_v28 = vpop.f32.mrb[1].mxu1  ;;  %v1453_v35 = vadd.f32 %v129_v27, %v51_v21  ;;  %v34_v21 = vld [vmem:[%s1590_s1 + $0xa0] sm:$0xff] }
  0xdd   :  { %1140 = vmatprep.mubr.msk.f32.mxu0 %vm52_vm1, %v229_v28  ;;  %1154 = vmatprep.mubr.msk.f32.mxu1 %vm52_vm1, %v229_v28 }
  0xde   :  { %1141 = vmatmul.mubr.msk.f32.vlgmr.msra.gmra.mrb[2].mxu0 %vm52_vm1, %v1128_v25  ;;  %1155 = vmatmul.mubr.msk.f32.vlgmr.msra.gmra.mrb[8].mxu1 %vm52_vm1, %v1128_v25 }
  0xdf   :  { %v1131_v30 = vpop.f32.mrb[2].mxu1  ;;  %1265 = vmatpush3.bf16.msra.mxu1 %v1262_v16 }
  0xe0   :  { %v239_v31 = vpop.f32.mrb[3].mxu1  ;;  %1267 = vmatprep.subr.bf16.mxu1 %v1266_v29 }
  0xe1   :  { %1143 = vmatprep.mubr.msk.f32.mxu0 %vm52_vm1, %v239_v31  ;;  %1157 = vmatprep.mubr.msk.f32.mxu1 %vm52_vm1, %v239_v31 }
  0xe2   :  { %1144 = vmatmul.mubr.msk.f32.gmra.mrb[4].mxu0 %vm52_vm1, %v1131_v30  ;;  %1158 = vmatmul.mubr.msk.f32.gmra.mrb[10].mxu1 %vm52_vm1, %v1131_v30 }
  0xe3   :  { %v1134_v32 = vpop.f32.mrb[4].mxu1  ;;  %1269 = vmatpush3.bf16.msra.mxu1 %v1266_v29 }
  0xe4   :  { %v249_v33 = vpop.f32.mrb[5].mxu1  ;;  %1271 = vmatprep.subr.bf16.mxu1 %v1270_v39 }
  0xe5   :  { %1146 = vmatprep.mubr.msk.f32.mxu0 %vm52_vm1, %v249_v33  ;;  %1160 = vmatprep.mubr.msk.f32.mxu1 %vm52_vm1, %v249_v33  ;;  %v37_v33 = vld [vmem:[%s1590_s1 + $0xb8] sm:$0xff] }
  0xe6   :  { %1147 = vmatmul.mubr.msk.f32.gmra.mrb[6].mxu0 %vm52_vm1, %v1134_v32  ;;  %1161 = vmatmul.mubr.msk.f32.gmra.mrb[12].mxu1 %vm52_vm1, %v1134_v32 }
  0xe7   :  { %v1137_v34 = vpop.f32.mrb[6].mxu1  ;;  %1273 = vmatpush3.bf16.msra.mxu1 %v1270_v39  ;;  %v36_v39 = vld [vmem:[%s1590_s1 + $0xb0] sm:$0xff] }
  0xe8   :  { %v259_v36 = vpop.f32.mrb[7].mxu1  ;;  %1275 = vmatprep.subr.bf16.mxu1 %v1274_v42 }
  0xe9   :  { %1149 = vmatprep.mubr.msk.f32.mxu0 %vm52_vm1, %v259_v36  ;;  %1163 = vmatprep.mubr.msk.f32.mxu1 %vm52_vm1, %v259_v36 }
  0xea   :  { %1150 = vmatmul.mubr.msk.f32.gmra.mrb[8].mxu0 %vm52_vm1, %v1137_v34  ;;  %1164 = vmatmul.mubr.msk.f32.gmra.mrb[14].mxu1 %vm52_vm1, %v1137_v34 }
  0xeb   :  { %1182 = vmatprep.mubr.msk.f32.mxu0 %vm532_vm3, %v1453_v35  ;;  %1277 = vmatpush3.bf16.msra.mxu1 %v1274_v42 }
 0x1b1   :  { %v1142_v48 = vpop.f32.mrb[2].mxu0  ;;  %v1156_v49 = vpop.f32.mrb[8].mxu1 }
 0x1b2   :  { %v371_v50 = vadd.f32 %v1142_v48, %v271_v45  ;;  %v491_v51 = vadd.f32 %v1156_v49, %v415_v46  ;;  %v365_v53 = vpop.f32.mrb[3].mxu0  ;;  %v485_v54 = vpop.f32.mrb[9].mxu1 }
 0x1b3   :  { %v366_v55 = vadd.f32 %v365_v53, %v271_v45  ;;  %v486_v56 = vadd.f32 %v485_v54, %v415_v46 }
 0x1b4   :  { %v405_v57 = vmul.f32 %v371_v50, %v31_v47  ;;  %v525_v58 = vmul.f32 %v491_v51, %v31_v47 }
 0x1b5   :  { %v404_v59 = vmul.f32 %v366_v55, %v30_v52  ;;  %v524_v60 = vmul.f32 %v486_v56, %v30_v52  ;;  %v1145_v62 = vpop.f32.mrb[4].mxu0  ;;  %v1159_v63 = vpop.f32.mrb[10].mxu1 }
 0x1b6   :  { %v381_v0 = vadd.f32 %v1145_v62, %v271_v45  ;;  %v501_v1 = vadd.f32 %v1159_v63, %v415_v46  ;;  %v375_v3 = vpop.f32.mrb[5].mxu0  ;;  %v495_v4 = vpop.f32.mrb[11].mxu1  ;;  %v46_v62 = vld [vmem:[%s1590_s1 + $0x100] sm:$0xff] }
 0x1b7   :  { %v1238_v6 = vpack.c.bf16 %v405_v57, %v404_v59  ;;  %v376_v7 = vadd.f32 %v375_v3, %v271_v45  ;;  %v496_v8 = vadd.f32 %v495_v4, %v415_v46  ;;  %v1495_v9 = vpack.c.bf16 %v525_v58, %v524_v60 }
 0x1b8   :  { %v407_v10 = vmul.f32 %v381_v0, %v33_v61  ;;  %v527_v11 = vmul.f32 %v501_v1, %v33_v61  ;;  %v47_v1 = vld [vmem:[%s1590_s1 + $0x108] sm:$0xff] }
 0x1b9   :  { %v406_v12 = vmul.f32 %v376_v7, %v32_v2  ;;  %v526_v13 = vmul.f32 %v496_v8, %v32_v2  ;;  %1240 = vmatprep.subr.msk.bf16.mxu0 %vm1491_vm4, %v1238_v6  ;;  %1279 = vmatprep.subr.bf16.mxu1 %v1495_v9  ;;  %v1148_v15 = vpop.f32.mrb[6].mxu0  ;;  %v1162_v16 = vpop.f32.mrb[12].mxu1 }
 0x1ba   :  { %1243 = vmatpush3.bf16.xpose.msk.msra.mxu0 %vm1491_vm4, %v1238_v6  ;;  %v391_v17 = vadd.f32 %v1148_v15, %v271_v45  ;;  %v511_v19 = vadd.f32 %v1162_v16, %v415_v46  ;;  %v385_v22 = vpop.f32.mrb[7].mxu0  ;;  %v505_v23 = vpop.f32.mrb[13].mxu1 }
 0x1bb   :  { %v1244_v24 = vpack.c.bf16 %v407_v10, %v406_v12  ;;  %v386_v25 = vadd.f32 %v385_v22, %v271_v45  ;;  %v506_v27 = vadd.f32 %v505_v23, %v415_v46  ;;  %v1282_v28 = vpack.c.bf16 %v527_v11, %v526_v13 }
 0x1bc   :  { %v409_v29 = vmul.f32 %v391_v17, %v35_v14  ;;  %v529_v30 = vmul.f32 %v511_v19, %v35_v14 }
 0x1bd   :  { %1246 = vmatprep.subr.msk.bf16.mxu0 %vm1491_vm4, %v1244_v24  ;;  %v408_v31 = vmul.f32 %v386_v25, %v34_v21  ;;  %v528_v32 = vmul.f32 %v506_v27, %v34_v21  ;;  %v1151_v34 = vpop.f32.mrb[8].mxu0  ;;  %v1165_v36 = vpop.f32.mrb[14].mxu1 }
 0x1be   :  { %v401_v37 = vadd.f32 %v1151_v34, %v271_v45  ;;  %v521_v38 = vadd.f32 %v1165_v36, %v415_v46  ;;  %v395_v40 = vpop.f32.mrb[9].mxu0  ;;  %v515_v41 = vpop.f32.mrb[15].mxu1 }
 0x1bf   :  { %v1250_v42 = vpack.c.bf16 %v409_v29, %v408_v31  ;;  %v396_v43 = vadd.f32 %v395_v40, %v271_v45  ;;  %v516_v44 = vadd.f32 %v515_v41, %v415_v46  ;;  %v1286_v47 = vpack.c.bf16 %v529_v30, %v528_v32  ;;  %v20_v30 = vld [vmem:[%s1590_s1 + $0x30] sm:$0xff]  ;;  %v21_v31 = vld [vmem:[%s1590_s1 + $0x38] sm:$0xff] }
 0x1c0   :  { %v411_v48 = vmul.f32 %v401_v37, %v37_v33  ;;  %v531_v49 = vmul.f32 %v521_v38, %v37_v33  ;;  %v1298_v32 = vpack.c.bf16 %v21_v31, %v20_v30  ;;  %v850_v40 = vsub.s32 4, %v1424_v18 }
 0x1c1   :  { %v410_v50 = vmul.f32 %v396_v43, %v36_v39  ;;  %v530_v51 = vmul.f32 %v516_v44, %v36_v39  ;;  %v856_v41 = vsub.s32 5, %v1424_v18 }
 0x1c2   :  { %1249 = vmatpush3.bf16.xpose.msk.msra.mxu0 %vm1491_vm4, %v1244_v24 }
 0x1c3   :  { %1252 = vmatprep.subr.msk.bf16.mxu0 %vm1491_vm4, %v1250_v42  ;;  %v1256_v52 = vpack.c.bf16 %v411_v48, %v410_v50  ;;  %v1290_v53 = vpack.c.bf16 %v531_v49, %v530_v51 }
 0x1ca   :  { %1255 = vmatpush3.bf16.xpose.msk.msra.mxu0 %vm1491_vm4, %v1250_v42  ;;  %v851_v42 = vrot.slane %v1430_v20, %v850_v40 }
 0x1cb   :  { %1258 = vmatprep.subr.msk.bf16.mxu0 %vm1491_vm4, %v1256_v52 }
 0x1d2   :  { %1261 = vmatpush3.bf16.xpose.msk.msra.mxu0 %vm1491_vm4, %v1256_v52 }
 0x1d9   :  { %1183 = vmatmul.mubr.msk.f32.vlgmr.msra.gmra.mrb[10].mxu0 %vm532_vm3, %v1439_v26 }
 0x2ac   :  { %v1184_v45 = vpop.f32.mrb[10].mxu0 }
 0x2ad   :  { %v629_v46 = vpop.f32.mrb[11].mxu0  ;;  %v642_v55 = vsel %vm638_vm5, %v1184_v45, -inf }
 0x2ae   :  { %v639_v54 = vsel %vm638_vm5, %v629_v46, -inf }
 0x2af   :  { %640 = vmax.xlane.f32.xlu0 %v639_v54 }
 0x2b3   :  { %643 = vmax.xlane.f32.xlu0 %v642_v55 }
 0x33c   :  { %v641_v56 = vpop.xlane.xlu0 %640 }
 0x33d   :  { %v645_v57 = vsub.f32 %v629_v46, %v641_v56 }
 0x33f   :  { %v647_v58 = vmul.f32 1.442695, %v645_v57 }
 0x340   :  { %v644_v59 = vpop.xlane.xlu0 %643 }
 0x341   :  { %1305 = vpow2.f32 %v647_v58  ;;  %v646_v60 = vsub.f32 %v1184_v45, %v644_v59  ;;  %v862_v45 = vsub.s32 3, %v1424_v18 }
 0x343   :  { %v649_v61 = vmul.f32 1.442695, %v646_v60  ;;  %v863_v46 = vrot.slane %v1430_v20, %v862_v45 }
 0x345   :  { %1307 = vpow2.f32 %v649_v61 }
 0x34b   :  { %v1306_v63 = vpop.eup %1305 }
 0x34c   :  { %v651_v0 = vmul.f32 %v1306_v63, %v46_v62 }
 0x34e   :  { %1201 = vmatprep.mubr.msk.f32.mxu1 %vm638_vm5, %v651_v0 }
 0x34f   :  { %v1308_v2 = vpop.eup %1307 }
 0x350   :  { %v652_v3 = vmul.f32 %v1308_v2, %v47_v1 }
 0x352   :  { %1202 = vmatmul.mubr.msk.f32.vlgmr.msra.gmra.mrb[16].mxu1 %vm638_vm5, %v652_v3 }
 0x353   :  { %1281 = vmatpush3.bf16.msra.mxu1 %v1495_v9 }
 0x354   :  { %1283 = vmatprep.subr.bf16.mxu1 %v1282_v28 }
 0x357   :  { %1285 = vmatpush3.bf16.msra.mxu1 %v1282_v28  ;;  %v19_v28 = vld [vmem:[%s1590_s1 + $0x28] sm:$0xff] }
 0x358   :  { %1287 = vmatprep.subr.bf16.mxu1 %v1286_v47 }
 0x35b   :  { %1289 = vmatpush3.bf16.msra.mxu1 %v1286_v47  ;;  %v857_v47 = vrot.slane %v1430_v20, %v856_v41 }
 0x35c   :  { %1291 = vmatprep.subr.bf16.mxu1 %v1290_v53 }
 0x35f   :  { %1293 = vmatpush3.bf16.msra.mxu1 %v1290_v53 }
 0x425   :  { %v1203_v4 = vpop.f32.mrb[16].mxu1 }
 0x426   :  { %1309 = vrcp.f32 %v1203_v4  ;;  %v725_v5 = vpop.f32.mrb[17].mxu1 }
 0x427   :  { %1311 = vrcp.f32 %v725_v5 }
 0x430   :  { %v1310_v6 = vpop.eup %1309 }
 0x431   :  { %v1312_v7 = vpop.eup %1311  ;;  %v737_v10 = vmul.f32 %v1310_v6, %v652_v3 }
 0x432   :  { %v736_v8 = vmul.f32 %v1312_v7, %v651_v0 }
 0x434   :  { %1220 = vmatprep.mubr.msk.f32.mxu1 %vm638_vm5, %v736_v8 }
 0x435   :  { %1221 = vmatmul.mubr.msk.f32.vlgmr.msra.gmra.mrb[18].mxu1 %vm638_vm5, %v737_v10 }
 0x508   :  { %v1222_v11 = vpop.f32.mrb[18].mxu1 }
 0x509   :  { %v810_v9 = vpop.f32.mrb[19].mxu1  ;;  %v820_v13 = vadd.f32 %v1222_v11, %v1439_v26  ;;  %v18_v26 = vld [vmem:[%s1590_s1 + $0x20] sm:$0xff]  ;;  %s1345_s1 = smov [#allocation2]  }
 0x50a   :  { %v819_v12 = vadd.f32 %v810_v9, %v1453_v35  ;;  %v1294_v29 = vpack.c.bf16 %v19_v28, %v18_v26  ;;  %s994_s22 = sshll.u32 %s1345_s1, 4  ;;  %s995_s22 = int_to_ptr.vmem [resolvable:$true] %s994_s22 }
 0x50b   :  { %v824_v15 = vsel %vm532_vm3, %v820_v13, 0.0  ;;  %s1321_s23 = scalar_lea.vmem %s995_s22, 256  ;;  %p1326_p1 = scmp.lt.s32.totalorder %s995_s22, %s995_s22 }
 0x50c   :  { %v821_v14 = vsel %vm532_vm3, %v819_v12, 0.0  ;;  %1295 = vmatprep.subr.bf16.mxu0 %v1294_v29  ;;  %p1322_p0 = scmp.ne.s32.totalorder %s995_s22, %s1321_s23  ;;  %p1327_p2 = scmp.lt.s32.totalorder %s1321_s23, %s1321_s23 }
 0x50d   :  { %822 = vadd.xlane.f32.xlu1 %v821_v14  ;;  %1297 = vmatpush3.bf16.msra.mxu0 %v1294_v29 }
 0x50e   :  { %1299 = vmatprep.subr.bf16.mxu0 %v1298_v32  ;;  %p1328_p3 = por %p1327_p2, %p1326_p1 }
 0x510   :  { %p1329_p4 = pnand %p1328_p3, %p1322_p0 }
 0x511   :  { %825 = vadd.xlane.f32.xlu1 %v824_v15  ;;  %1301 = vmatpush3.bf16.msra.mxu0 %v1298_v32 }
 0x59a   :  { %v823_v16 = vpop.xlane.xlu1 %822 }
 0x59b   :  { %v828_v17 = vmul.f32 0.03125, %v823_v16  ;;  %v977_v16 = vsub.s32 6, %v1424_v18 }
 0x59d   :  { %v830_v19 = vsub.f32 %v819_v12, %v828_v17  ;;  %v983_v17 = vsub.s32 7, %v1424_v18 }
 0x59e   :  { %v826_v21 = vpop.xlane.xlu1 %825 }
 0x59f   :  { %v829_v22 = vmul.f32 0.03125, %v826_v21  ;;  %v832_v23 = vmul.f32 %v830_v19, %v830_v19 }
 0x5a1   :  { %v831_v24 = vsub.f32 %v820_v13, %v829_v22  ;;  %v834_v25 = vsel %vm532_vm3, %v832_v23, 0.0 }
 0x5a2   :  { %835 = vadd.xlane.f32.xlu0 %v834_v25 }
 0x5a3   :  { %v833_v27 = vmul.f32 %v831_v24, %v831_v24 }
 0x5a5   :  { %v837_v35 = vsel %vm532_vm3, %v833_v27, 0.0 }
 0x5a6   :  { %838 = vadd.xlane.f32.xlu1 %v837_v35 }
 0x62f   :  { %v836_v33 = vpop.xlane.xlu0 %835 }
 0x630   :  { %v840_v34 = vmul.f32 0.03125, %v836_v33 }
 0x632   :  { %v842_v36 = vadd.f32 1e-05, %v840_v34 }
 0x633   :  { %v839_v37 = vpop.xlane.xlu1 %838 }
 0x634   :  { %1313 = vrsqrt.f32 %v842_v36  ;;  %v841_v38 = vmul.f32 0.03125, %v839_v37 }
 0x636   :  { %v843_v39 = vadd.f32 1e-05, %v841_v38 }
 0x638   :  { %1315 = vrsqrt.f32 %v843_v39 }
 0x63e   :  { %v1314_v43 = vpop.eup %1313 }
 0x63f   :  { %v846_v44 = vmul.f32 %v1314_v43, %v830_v19  ;;  %v978_v19 = vrot.slane %v1430_v20, %v977_v16 }
 0x641   :  { %v852_v48 = vmul.f32 %v851_v42, %v846_v44 }
 0x642   :  { %v1316_v49 = vpop.eup %1315 }
 0x643   :  { %v847_v50 = vmul.f32 %v1316_v49, %v831_v24  ;;  %v858_v51 = vadd.f32 %v857_v47, %v852_v48  ;;  %v984_v24 = vrot.slane %v1430_v20, %v983_v17 }
 0x645   :  { %v853_v52 = vmul.f32 %v851_v42, %v847_v50  ;;  %1231 = vmatprep.mubr.msk.f32.mxu0 %vm532_vm3, %v858_v51 }
 0x647   :  { %v859_v53 = vadd.f32 %v857_v47, %v853_v52 }
 0x649   :  { %1232 = vmatmul.mubr.msk.f32.vlgmr.msra.gmra.mrb[12].mxu0 %vm532_vm3, %v859_v53 }
 0x71c   :  { %v1233_v54 = vpop.f32.mrb[12].mxu0 }
 0x71d   :  { %v942_v55 = vadd.f32 %v1233_v54, %v863_v46  ;;  %v936_v56 = vpop.f32.mrb[13].mxu0 }
 0x71e   :  { %v937_v57 = vadd.f32 %v936_v56, %v863_v46 }
 0x71f   :  { %v946_v58 = vmax.f32 %v942_v55, 0.0 }
 0x720   :  { %v945_v59 = vmax.f32 %v937_v57, 0.0 }
 0x721   :  { %v948_v60 = vadd.f32 %v946_v58, %v859_v53 }
 0x722   :  { %v947_v61 = vadd.f32 %v945_v59, %v858_v51 }
 0x723   :  { %v952_v62 = vsel %vm532_vm3, %v948_v60, 0.0 }
 0x724   :  { %953 = vadd.xlane.f32.xlu1 %v952_v62  ;;  %v949_v63 = vsel %vm532_vm3, %v947_v61, 0.0 }
 0x725   :  { %950 = vadd.xlane.f32.xlu0 %v949_v63 }
 0x7b1   :  { %v954_v0 = vpop.xlane.xlu1 %953 }
 0x7b2   :  { %v956_v1 = vmul.f32 0.03125, %v954_v0  ;;  %v951_v2 = vpop.xlane.xlu0 %950 }
 0x7b3   :  { %v955_v3 = vmul.f32 0.03125, %v951_v2 }
 0x7b4   :  { %v958_v4 = vsub.f32 %v948_v60, %v956_v1 }
 0x7b5   :  { %v957_v5 = vsub.f32 %v947_v61, %v955_v3 }
 0x7b6   :  { %v960_v6 = vmul.f32 %v958_v4, %v958_v4 }
 0x7b7   :  { %v959_v7 = vmul.f32 %v957_v5, %v957_v5 }
 0x7b8   :  { %v964_v8 = vsel %vm532_vm3, %v960_v6, 0.0 }
 0x7b9   :  { %965 = vadd.xlane.f32.xlu1 %v964_v8  ;;  %v961_v10 = vsel %vm532_vm3, %v959_v7, 0.0 }
 0x7ba   :  { %962 = vadd.xlane.f32.xlu0 %v961_v10 }
 0x846   :  { %v966_v11 = vpop.xlane.xlu1 %965 }
 0x847   :  { %v968_v9 = vmul.f32 0.03125, %v966_v11  ;;  %v963_v12 = vpop.xlane.xlu0 %962 }
 0x848   :  { %v967_v13 = vmul.f32 0.03125, %v963_v12 }
 0x849   :  { %v970_v14 = vadd.f32 1e-05, %v968_v9 }
 0x84a   :  { %v969_v15 = vadd.f32 1e-05, %v967_v13 }
 0x84b   :  { %1317 = vrsqrt.f32 %v970_v14 }
 0x84c   :  { %1319 = vrsqrt.f32 %v969_v15 }
 0x855   :  { %v1318_v21 = vpop.eup %1317 }
 0x856   :  { %v1320_v22 = vpop.eup %1319  ;;  %v974_v23 = vmul.f32 %v1318_v21, %v958_v4 }
 0x857   :  { %v973_v25 = vmul.f32 %v1320_v22, %v957_v5 }
 0x858   :  { %v980_v27 = vmul.f32 %v978_v19, %v974_v23 }
 0x859   :  { %v979_v35 = vmul.f32 %v978_v19, %v973_v25 }
 0x85a   :  { %v986_v26 = vadd.f32 %v984_v24, %v980_v27 }
 0x85b   :  { %v985_v28 = vadd.f32 %v984_v24, %v979_v35 }
 0x85c   :  { %988 = vst.msk [vmem:[#allocation2 + $0x8] sm:$0xff] %vm532_vm3, %v986_v26 }
 0x85d   :  { %987 = vst.msk [vmem:[#allocation2] sm:$0xff] %vm532_vm3, %v985_v28 }
 0x85e   :  { %1332 = shalt.err (!%p1329_p4)
}
 0x85f   :  { %s1333_s26 = scalar_lea.hbm %s1591_s2, 256 }
 0x860   :  { %p1334_p5 = scmp.ne.s32.totalorder %s1591_s2, %s1333_s26  ;;  %p1337_p6 = scmp.lt.u32.totalorder %s1333_s26, %s1591_s2 }
 0x862   :  { %p1339_p7 = pnand %p1337_p6, %p1334_p5 }
 0x864   :  { %1342 = shalt.err (!%p1339_p7)
}
 0x865   :  { %s1346_s3 = smov 128   ;;  %s1347_s4 = smov 8  }
 0x866   :  { %1000 = dma.vmem_to_hbm [thread:$0]  %s995_s22, 256, %s1591_s2, [#allocation3], %s1346_s3, %s1346_s3, %s1347_s4  }
 0x867   :  { %1343 = dma.done.wait [#allocation3], 256  }
 0x868   :  { %1344 = vsyncadd [#allocation3], 4294967040 }
 0x869   :  { %1004 = vsyncpa [#allocation3], 1 }

</bundles_post_ra>
